<compile_context>
chip_gen: v5e
topology: v5e:2x2
jax: 0.10.0
libtpu: 0.0.40
codegen_flags: <defaults>
</compile_context>

<pallas_src>
import functools

import jax
import jax.numpy as jnp
from jax.experimental import pallas as pl
from jax.experimental.pallas import tpu as pltpu


def _mlp_kernel(x_ref, w1_ref, b1_ref, w2_ref, b2_ref, o_ref, *, bf16_tanh):
    # Layer 1: (tb, S) @ (S, H1) -> bf16 operands, f32 accumulation on the MXU.
    x = x_ref[...].astype(jnp.bfloat16)
    h1 = jnp.dot(x, w1_ref[...], preferred_element_type=jnp.float32)
    h1 = h1 + b1_ref[...]                      # f32 bias, (1,H1) broadcasts over batch
    if bf16_tanh:
        # bf16 EUP tanh (v6e/v7x): ~2x faster; value is fed to a bf16 matmul anyway.
        h1 = jnp.tanh(h1.astype(jnp.bfloat16))
    else:
        # f32 tanh path for v5e (no bf16 EUP), then cast for the bf16 MXU.
        h1 = jnp.tanh(h1).astype(jnp.bfloat16)
    # Layer 2: (tb, H1) @ (H1, H2), f32 accumulation; final tanh stays f32.
    h2 = jnp.dot(h1, w2_ref[...], preferred_element_type=jnp.float32)
    o_ref[...] = jnp.tanh(h2 + b2_ref[...]).astype(o_ref.dtype)


def _round_up(x, m):
    return ((x + m - 1) // m) * m


def feature_extractor_forward(x, w1, b1, w2, b2, *, batch_tile=2048,
                              bf16_tanh=True):
    """Pallas forward for FeatureExtractorNetwork.

    x  : (B, state_size) float32
    w1 : (state_size, hid1) bf16/f32, b1: (1, hid1) f32
    w2 : (hid1, hid2)       bf16/f32, b2: (1, hid2) f32
    returns (B, hid2) float32

    batch_tile: per-grid-step batch tile. 2048 is a good default on v5e/v6e
    (128 MiB VMEM); keep <= ~4096 on v7x (64 MiB VMEM).
    bf16_tanh:  compute layer-1 tanh in bf16 (recommended on v6e/v7x; set
    False on v5e which has no bf16 EUP).
    """
    B, S = x.shape
    H1 = w1.shape[1]
    H2 = w2.shape[1]

    # bf16 weights (~288 KiB instead of ~576 KiB per-call weight DMA); no-op if
    # the caller already stores them in bf16 (recommended for per-step RL use).
    w1 = w1.astype(jnp.bfloat16)
    w2 = w2.astype(jnp.bfloat16)
    b1 = b1.astype(jnp.float32)
    b2 = b2.astype(jnp.float32)

    # Fixed batch tile + cdiv grid. Never let the block equal the full batch
    # for large B (VMEM blow-up, no pipelining). Guarantee >=2 grid steps when
    # B >= 16 so the "parallel" batch axis shards across both v7x TensorCores.
    tb = min(batch_tile, max(8, _round_up(pl.cdiv(B, 2), 8)))
    grid = (pl.cdiv(B, tb),)

    # Advisory cost estimate for XLA's scheduler around the custom call.
    flops = 2 * B * (S * H1 + H1 * H2)
    transcendentals = B * (H1 + H2)
    bytes_accessed = (B * (S + H2) * 4            # x read + y write (f32)
                      + (S * H1 + H1 * H2) * 2    # bf16 weights
                      + (H1 + H2) * 4)            # f32 biases
    cost = pl.CostEstimate(flops=flops, transcendentals=transcendentals,
                           bytes_accessed=bytes_accessed)

    # Only request extra scoped VMEM for oversized tiles; tb<=2048 fits the
    # default 32 MiB scoped limit comfortably (~10-12 MiB resident).
    vmem_limit = None if tb <= 2048 else 64 * 1024 * 1024

    kernel = functools.partial(_mlp_kernel, bf16_tanh=bf16_tanh)

    return pl.pallas_call(
        kernel,
        out_shape=jax.ShapeDtypeStruct((B, H2), jnp.float32),
        grid_spec=pltpu.PrefetchScalarGridSpec(
            num_scalar_prefetch=0,
            grid=grid,
            in_specs=[
                pl.BlockSpec((tb, S), lambda i: (i, 0)),     # batch tile of x
                pl.BlockSpec((S, H1), lambda i: (0, 0)),     # weights: constant
                pl.BlockSpec((1, H1), lambda i: (0, 0)),     #   index_map ->
                pl.BlockSpec((H1, H2), lambda i: (0, 0)),    #   fetched once,
                pl.BlockSpec((1, H2), lambda i: (0, 0)),     #   VMEM-resident
            ],
            out_specs=pl.BlockSpec((tb, H2), lambda i: (i, 0)),
        ),
        compiler_params=pltpu.CompilerParams(
            dimension_semantics=("parallel",),   # batch axis -> megacore on v7x
            vmem_limit_bytes=vmem_limit,
        ),
        cost_estimate=cost,
    )(x, w1, b1, w2, b2)


def init_params(key, state_size, hidsize1=512, hidsize2=256):
    """Mimics PyTorch default Linear init (U[-1/sqrt(fan_in), 1/sqrt(fan_in)]).
    Weights returned transposed ((in, out)) and pre-cast to bf16 once so the
    per-call HBM weight traffic is halved; biases stay f32."""
    k1, k2, k3, k4 = jax.random.split(key, 4)
    bound1 = 1.0 / jnp.sqrt(jnp.float32(state_size))
    bound2 = 1.0 / jnp.sqrt(jnp.float32(hidsize1))
    w1 = jax.random.uniform(k1, (state_size, hidsize1), jnp.float32, -bound1, bound1)
    b1 = jax.random.uniform(k2, (1, hidsize1), jnp.float32, -bound1, bound1)
    w2 = jax.random.uniform(k3, (hidsize1, hidsize2), jnp.float32, -bound2, bound2)
    b2 = jax.random.uniform(k4, (1, hidsize2), jnp.float32, -bound2, bound2)
    return w1.astype(jnp.bfloat16), b1, w2.astype(jnp.bfloat16), b2


if __name__ == "__main__":
    key = jax.random.PRNGKey(0)
    kx, kp = jax.random.split(key)

    batch = 8
    state_size = 32
    hidsize1 = 512
    hidsize2 = 256

    x = jax.random.normal(kx, (batch, state_size), jnp.float32)
    w1, b1, w2, b2 = init_params(kp, state_size, hidsize1, hidsize2)

    out = feature_extractor_forward(x, w1, b1, w2, b2)
    out = jax.block_until_ready(out)
    assert out.shape == (batch, hidsize2)
    assert out.dtype == jnp.float32

    # Reference with the same dtype path as the kernel (bf16 matmuls, f32 acc,
    # bf16 layer-1 tanh, f32 output tanh).
    h1 = jnp.dot(x.astype(jnp.bfloat16), w1, preferred_element_type=jnp.float32) + b1
    h1 = jnp.tanh(h1.astype(jnp.bfloat16))
    ref = jnp.tanh(jnp.dot(h1, w2, preferred_element_type=jnp.float32) + b2)
    assert jnp.allclose(out, ref, atol=2e-3, rtol=2e-3)

    # Loose sanity check against full-f32 math (PyTorch-equivalent semantics).
    ref_f32 = jnp.tanh(jnp.tanh(x @ w1.astype(jnp.float32) + b1)
                       @ w2.astype(jnp.float32) + b2)
    assert jnp.allclose(out, ref_f32, atol=5e-2, rtol=5e-2)

    print("KERNEL_OK")
</pallas_src>

<mosaic_0001>
module attributes {stable_mosaic.version = 11 : i64} {
  func.func @_mlp_kernel(%arg0: i32, %arg1: memref<8x32xf32, #tpu.memory_space<vmem>>, %arg2: memref<32x512xbf16, #tpu.memory_space<vmem>>, %arg3: memref<1x512xf32, #tpu.memory_space<vmem>>, %arg4: memref<512x256xbf16, #tpu.memory_space<vmem>>, %arg5: memref<1x256xf32, #tpu.memory_space<vmem>>, %arg6: memref<8x256xf32, #tpu.memory_space<vmem>>) attributes {dimension_semantics = [#tpu.dimension_semantics<parallel>], iteration_bounds = array<i64: 1>, scalar_prefetch = 0 : i64, scratch_operands = 0 : i64, tpu.core_type = #tpu.core_type<tc>, window_params = [{transform_indices = @transform_0, window_bounds = array<i64: 8, 32>}, {pipeline_mode = #tpu.pipeline_mode<synchronous>, transform_indices = @transform_1, window_bounds = array<i64: 32, 512>}, {pipeline_mode = #tpu.pipeline_mode<synchronous>, transform_indices = @transform_2, window_bounds = array<i64: 1, 512>}, {pipeline_mode = #tpu.pipeline_mode<synchronous>, transform_indices = @transform_3, window_bounds = array<i64: 512, 256>}, {pipeline_mode = #tpu.pipeline_mode<synchronous>, transform_indices = @transform_4, window_bounds = array<i64: 1, 256>}, {transform_indices = @transform_5, window_bounds = array<i64: 8, 256>}]} {
    %c0 = arith.constant 0 : index
    %c0_0 = arith.constant 0 : index
    %0 = vector.load %arg1[%c0, %c0_0] : memref<8x32xf32, #tpu.memory_space<vmem>>, vector<8x32xf32>
    %1 = arith.truncf %0 : vector<8x32xf32> to vector<8x32xbf16>
    %c0_1 = arith.constant 0 : index
    %c0_2 = arith.constant 0 : index
    %2 = vector.load %arg2[%c0_1, %c0_2] : memref<32x512xbf16, #tpu.memory_space<vmem>>, vector<32x512xbf16>
    %cst = arith.constant dense<0.000000e+00> : vector<8x512xf32>
    %3 = tpu.matmul %1, %2, %cst {dimension_numbers = #tpu.dot_dimension_numbers<[1], [0], [0], [1], [0, 0, 1, 1], [], []>} : vector<8x32xbf16>, vector<32x512xbf16>, vector<8x512xf32> -> vector<8x512xf32>
    %c0_3 = arith.constant 0 : index
    %c0_4 = arith.constant 0 : index
    %4 = vector.load %arg3[%c0_3, %c0_4] : memref<1x512xf32, #tpu.memory_space<vmem>>, vector<1x512xf32>
    %5 = vector.broadcast %4 : vector<1x512xf32> to vector<8x512xf32>
    %6 = arith.addf %3, %5 : vector<8x512xf32>
    %7 = arith.truncf %6 : vector<8x512xf32> to vector<8x512xbf16>
    %8 = math.tanh %7 : vector<8x512xbf16>
    %c0_5 = arith.constant 0 : index
    %c0_6 = arith.constant 0 : index
    %9 = vector.load %arg4[%c0_5, %c0_6] : memref<512x256xbf16, #tpu.memory_space<vmem>>, vector<512x256xbf16>
    %cst_7 = arith.constant dense<0.000000e+00> : vector<8x256xf32>
    %10 = tpu.matmul %8, %9, %cst_7 {dimension_numbers = #tpu.dot_dimension_numbers<[1], [0], [0], [1], [0, 0, 1, 1], [], []>} : vector<8x512xbf16>, vector<512x256xbf16>, vector<8x256xf32> -> vector<8x256xf32>
    %c0_8 = arith.constant 0 : index
    %c0_9 = arith.constant 0 : index
    %11 = vector.load %arg5[%c0_8, %c0_9] : memref<1x256xf32, #tpu.memory_space<vmem>>, vector<1x256xf32>
    %12 = vector.broadcast %11 : vector<1x256xf32> to vector<8x256xf32>
    %13 = arith.addf %10, %12 : vector<8x256xf32>
    %14 = math.tanh %13 : vector<8x256xf32>
    %c0_10 = arith.constant 0 : index
    %c0_11 = arith.constant 0 : index
    %15 = vector.load %arg6[%c0_10, %c0_11] : memref<8x256xf32, #tpu.memory_space<vmem>>, vector<8x256xf32>
    tpu.vector_store %arg6[%c0_10, %c0_11], %14 {strides = array<i32>} : memref<8x256xf32, #tpu.memory_space<vmem>>, vector<8x256xf32>,
    return
  }
  func.func @transform_0(%arg0: i32) -> (i32, i32) {
    %c0_i32 = arith.constant 0 : i32
    %c0_i32_0 = arith.constant 0 : i32
    return %arg0, %c0_i32 : i32, i32
  }
  func.func @transform_1(%arg0: i32) -> (i32, i32) {
    %c0_i32 = arith.constant 0 : i32
    %c0_i32_0 = arith.constant 0 : i32
    %c0_i32_1 = arith.constant 0 : i32
    return %c0_i32, %c0_i32_0 : i32, i32
  }
  func.func @transform_2(%arg0: i32) -> (i32, i32) {
    %c0_i32 = arith.constant 0 : i32
    %c0_i32_0 = arith.constant 0 : i32
    %c0_i32_1 = arith.constant 0 : i32
    return %c0_i32, %c0_i32_0 : i32, i32
  }
  func.func @transform_3(%arg0: i32) -> (i32, i32) {
    %c0_i32 = arith.constant 0 : i32
    %c0_i32_0 = arith.constant 0 : i32
    %c0_i32_1 = arith.constant 0 : i32
    return %c0_i32, %c0_i32_0 : i32, i32
  }
  func.func @transform_4(%arg0: i32) -> (i32, i32) {
    %c0_i32 = arith.constant 0 : i32
    %c0_i32_0 = arith.constant 0 : i32
    %c0_i32_1 = arith.constant 0 : i32
    return %c0_i32, %c0_i32_0 : i32, i32
  }
  func.func @transform_5(%arg0: i32) -> (i32, i32) {
    %c0_i32 = arith.constant 0 : i32
    %c0_i32_0 = arith.constant 0 : i32
    return %arg0, %c0_i32 : i32, i32
  }
}

</mosaic_0001>

<bundles_post_ra>
// kernel: tpu_custom_call.1
= control target key start
LH: loop header
LB: loop body
LE: loop exit
PB: predicated region body
PF: predicated region fallthrough
CT: control target
= control target key end

     0   :  { %10 = vsyncpa [#allocation3], 0  ;;  %s1310_s0 = inlined_call_operand.hbm [shape: f32[8,32], index: 0, kind: input, shape index: {}]   ;;  %s1311_s1 = inlined_call_operand.hbm [shape: bf16[32,512], index: 1, kind: input, shape index: {}]   ;;  %s1312_s2 = inlined_call_operand.hbm [shape: f32[1,512], index: 2, kind: input, shape index: {}]   ;;  %s1313_s3 = inlined_call_operand.hbm [shape: bf16[512,256], index: 3, kind: input, shape index: {}]   ;;  %s1314_s4 = inlined_call_operand.vmem [shape: f32[1,256], index: 4, kind: input, shape index: {}]   ;;  %s1315_s5 = inlined_call_operand.hbm [shape: f32[8,256], index: 5, kind: output, shape index: {}]  }
   0x1   :  { %11 = vsyncpa [#allocation6], 0 }
   0x2   :  { %12 = vsyncpa [#allocation9], 0  ;;  %s29_s20 = sshll.u32 %s1311_s1, 4  ;;  %s30_s20 = int_to_ptr.hbm [resolvable:$true] %s29_s20 }
   0x3   :  { %13 = vsyncpa [#allocation4], 0  ;;  %s1243_s21 = smov [#allocation5]   ;;  %s19_s25 = sshll.u32 %s1310_s0, 4  ;;  %s20_s25 = int_to_ptr.hbm [resolvable:$true] %s19_s25 }
   0x4   :  { %s31_s22 = sshll.u32 %s1243_s21, 4  ;;  %s1244_s26 = smov 256   ;;  %s32_s22 = int_to_ptr.vmem [resolvable:$true] %s31_s22 }
   0x5   :  { %s1245_s27 = smov 16   ;;  %s1246_s28 = smov [#allocation2]  }
   0x6   :  { %37 = dma.hbm_to_vmem [thread:$0]  %s30_s20, 1024, %s32_s22, [#allocation6], %s1244_s26, %s1244_s26, %s1245_s27  }
   0x7   :  { %s21_s29 = sshll.u32 %s1246_s28, 4  ;;  %s43_s7 = sshll.u32 %s1312_s2, 4  ;;  %s22_s29 = int_to_ptr.vmem [resolvable:$true] %s21_s29  ;;  %s44_s7 = int_to_ptr.hbm [resolvable:$true] %s43_s7 }
   0x8   :  { %24 = dma.hbm_to_vmem [thread:$0]  %s20_s25, 128, %s22_s29, [#allocation3]  }
   0x9   :  { %s53_s9 = sshll.u32 %s1313_s3, 4  ;;  %s1247_s10 = smov [#allocation7]   ;;  %s54_s9 = int_to_ptr.hbm [resolvable:$true] %s53_s9 }
   0xa   :  { %s45_s11 = sshll.u32 %s1247_s10, 4  ;;  %s1248_s0 = smov [#allocation8]   ;;  %s46_s11 = int_to_ptr.vmem [resolvable:$true] %s45_s11 }
   0xb   :  { %48 = dma.hbm_to_vmem [thread:$0]  %s44_s7, 64, %s46_s11, [#allocation6]  }
   0xc   :  { %s55_s12 = sshll.u32 %s1248_s0, 4  ;;  %s1249_s13 = smov 128   ;;  %s56_s12 = int_to_ptr.vmem [resolvable:$true] %s55_s12 }
   0xd   :  { %s1250_s14 = smov 8  }
   0xe   :  { %61 = dma.hbm_to_vmem [thread:$0]  %s54_s9, 8192, %s56_s12, [#allocation9], %s1249_s13, %s1249_s13, %s1250_s14  }
   0xf   :  { %1235 = dma.done.wait [#allocation3], 128  }
  0x10   :  { %1236 = vsyncadd [#allocation3], 4294967168 }
  0x11   :  { %1237 = dma.done.wait [#allocation6], 1088  }
  0x12   :  { %1238 = vsyncadd [#allocation6], 4294966208 }
  0x13   :  { %1239 = dma.done.wait [#allocation9], 8192  }
  0x14   :  { %1240 = vsyncadd [#allocation9], 4294959104  ;;  %v748_v0 = vld [vmem:[#allocation5 + $0x20] sm:$0xf]  ;;  %v1028_v1 = vld [vmem:[#allocation5 + $0x2c] sm:$0xf0] }
  0x15   :  { %v1026_v2 = vld [vmem:[#allocation5 + $0x24] sm:$0xf]  ;;  %v749_v3 = vor.u32 %v1028_v1, %v748_v0  ;;  %v750_v4 = vld [vmem:[#allocation5 + $0x30] sm:$0xf0]  ;;  %v756_v5 = vld [vmem:[#allocation5 + $0x28] sm:$0xf] }
  0x16   :  { %v1029_v6 = vld [vmem:[#allocation5 + $0x34] sm:$0xf0]  ;;  %v753_v7 = vor.u32 %v1026_v2, %v750_v4  ;;  %v1027_v9 = vld [vmem:[#allocation5 + $0x2c] sm:$0xf]  ;;  %v758_v10 = vld [vmem:[#allocation5 + $0x38] sm:$0xf0] }
  0x17   :  { %v757_v8 = vor.u32 %v1029_v6, %v756_v5  ;;  %v732_v11 = vld [vmem:[#allocation5] sm:$0xf]  ;;  %151 = vmatpush.bf16.msra.mxu0 %v749_v3  ;;  %v761_v12 = vor.u32 %v1027_v9, %v758_v10  ;;  %v1024_v13 = vld [vmem:[#allocation5 + $0xc] sm:$0xf0]  ;;  %v1022_v14 = vld [vmem:[#allocation5 + $0x4] sm:$0xf] }
  0x18   :  { %v734_v15 = vld [vmem:[#allocation5 + $0x10] sm:$0xf0]  ;;  %164 = vmatpush.bf16.msra.mxu1 %v753_v7  ;;  %v733_v16 = vor.u32 %v1024_v13, %v732_v11  ;;  %v740_v18 = vld [vmem:[#allocation5 + $0x8] sm:$0xf]  ;;  %v1025_v19 = vld [vmem:[#allocation5 + $0x14] sm:$0xf0] }
  0x19   :  { %177 = vmatpush.bf16.msra.mxu2 %v757_v8  ;;  %v737_v17 = vor.u32 %v1022_v14, %v734_v15  ;;  %v1023_v20 = vld [vmem:[#allocation5 + $0xc] sm:$0xf]  ;;  %190 = vmatpush.bf16.msra.mxu3 %v761_v12  ;;  %v741_v21 = vor.u32 %v1025_v19, %v740_v18  ;;  %v742_v22 = vld [vmem:[#allocation5 + $0x18] sm:$0xf0]  ;;  %vm141_vm0 = vcmask 261120   ;;  %s718_s18 = sshll.u32 %s1315_s5, 4  ;;  %s719_s18 = int_to_ptr.hbm [resolvable:$true] %s718_s18 }
  0x1a   :  { %v81_v23 = vld [vmem:[#allocation2] sm:$0xff]  ;;  %v824_v24 = vld [vmem:[#allocation8 + $0x70] sm:$0xf]  ;;  %v745_v25 = vor.u32 %v1023_v20, %v742_v22  ;;  %v816_v32 = vld [vmem:[#allocation8 + $0x60] sm:$0xf] }
  0x1b   :  { %v82_v26 = vpack.c.bf16 %v81_v23, %v81_v23  ;;  %v1045_v27 = vld [vmem:[#allocation8 + $0x74] sm:$0xf0]  ;;  %v888_v28 = vld [vmem:[#allocation8 + $0xf0] sm:$0xf]  ;;  %152 = vmatpush.bf16.msra.mxu0 %v733_v16  ;;  %v1043_v33 = vld [vmem:[#allocation8 + $0x64] sm:$0xf0] }
  0x1c   :  { %v1061_v29 = vld [vmem:[#allocation8 + $0xf4] sm:$0xf0]  ;;  %v825_v30 = vor.u32 %v1045_v27, %v824_v24  ;;  %v880_v34 = vld [vmem:[#allocation8 + $0xe0] sm:$0xf]  ;;  %165 = vmatpush.bf16.msra.mxu1 %v737_v17  ;;  %v1059_v35 = vld [vmem:[#allocation8 + $0xe4] sm:$0xf0]  ;;  %v817_v38 = vor.u32 %v1043_v33, %v816_v32 }
  0x1d   :  { %v889_v31 = vor.u32 %v1061_v29, %v888_v28  ;;  %178 = vmatpush.bf16.msra.mxu2 %v741_v21  ;;  %v952_v36 = vld [vmem:[#allocation8 + $0x170] sm:$0xf]  ;;  %v1077_v37 = vld [vmem:[#allocation8 + $0x174] sm:$0xf0]  ;;  %191 = vmatpush.bf16.msra.mxu3 %v745_v25  ;;  %v881_v43 = vor.u32 %v1059_v35, %v880_v34  ;;  %v944_v48 = vld [vmem:[#allocation8 + $0x160] sm:$0xf] }
  0x1e   :  { %v953_v39 = vor.u32 %v1077_v37, %v952_v36  ;;  %v1016_v40 = vld [vmem:[#allocation8 + $0x1f0] sm:$0xf]  ;;  %v1093_v41 = vld [vmem:[#allocation8 + $0x1f4] sm:$0xf0]  ;;  %762 = vmatmul.msk.bf16.vlgmr.msra.gmra.mxu0 %vm141_vm0, %v82_v26  ;;  %v1075_v49 = vld [vmem:[#allocation8 + $0x164] sm:$0xf0] }
  0x1f   :  { %603 = vmatpush.bf16.msrb.mxu0 %v825_v30  ;;  %v808_v42 = vld [vmem:[#allocation8 + $0x50] sm:$0xf]  ;;  %v1017_v44 = vor.u32 %v1093_v41, %v1016_v40  ;;  %v1041_v45 = vld [vmem:[#allocation8 + $0x54] sm:$0xf0]  ;;  %763 = vmatmul.msk.bf16.vlgmr.msra.gmra.mxu1 %vm141_vm0, %v82_v26  ;;  %v1008_v50 = vld [vmem:[#allocation8 + $0x1e0] sm:$0xf]  ;;  %v945_v51 = vor.u32 %v1075_v49, %v944_v48 }
  0x20   :  { %616 = vmatpush.bf16.msrb.mxu1 %v889_v31  ;;  %v872_v46 = vld [vmem:[#allocation8 + $0xd0] sm:$0xf]  ;;  %v1057_v47 = vld [vmem:[#allocation8 + $0xd4] sm:$0xf0]  ;;  %764 = vmatmul.msk.bf16.vlgmr.msra.gmra.mxu2 %vm141_vm0, %v82_v26  ;;  %v1091_v52 = vld [vmem:[#allocation8 + $0x1e4] sm:$0xf0]  ;;  %v809_v53 = vor.u32 %v1041_v45, %v808_v42 }
  0x21   :  { %765 = vmatmul.msk.bf16.vlgmr.msra.gmra.mxu3 %vm141_vm0, %v82_v26  ;;  %629 = vmatpush.bf16.msrb.mxu2 %v953_v39  ;;  %v1009_v54 = vor.u32 %v1091_v52, %v1008_v50  ;;  %v800_v55 = vld [vmem:[#allocation8 + $0x40] sm:$0xf]  ;;  %v1039_v56 = vld [vmem:[#allocation8 + $0x44] sm:$0xf0]  ;;  %v936_v57 = vld [vmem:[#allocation8 + $0x150] sm:$0xf]  ;;  %v873_v58 = vor.u32 %v1057_v47, %v872_v46 }
  0x22   :  { %642 = vmatpush.bf16.msrb.mxu3 %v1017_v44  ;;  %v1073_v59 = vld [vmem:[#allocation8 + $0x154] sm:$0xf0]  ;;  %v1000_v60 = vld [vmem:[#allocation8 + $0x1d0] sm:$0xf]  ;;  %v864_v62 = vld [vmem:[#allocation8 + $0xc0] sm:$0xf]  ;;  %v801_v1 = vor.u32 %v1039_v56, %v800_v55 }
  0x23   :  { %604 = vmatpush.bf16.msrb.mxu0 %v817_v38  ;;  %v1089_v61 = vld [vmem:[#allocation8 + $0x1d4] sm:$0xf0]  ;;  %v1055_v63 = vld [vmem:[#allocation8 + $0xc4] sm:$0xf0]  ;;  %v937_v0 = vor.u32 %v1073_v59, %v936_v57  ;;  %v792_v3 = vld [vmem:[#allocation8 + $0x30] sm:$0xf] }
  0x24   :  { %617 = vmatpush.bf16.msrb.mxu1 %v881_v43  ;;  %v1001_v2 = vor.u32 %v1089_v61, %v1000_v60  ;;  %v928_v4 = vld [vmem:[#allocation8 + $0x140] sm:$0xf]  ;;  %v1071_v5 = vld [vmem:[#allocation8 + $0x144] sm:$0xf0]  ;;  %v865_v6 = vor.u32 %v1055_v63, %v864_v62  ;;  %v1037_v7 = vld [vmem:[#allocation8 + $0x34] sm:$0xf0] }
  0x25   :  { %630 = vmatpush.bf16.msrb.mxu2 %v945_v51  ;;  %v992_v8 = vld [vmem:[#allocation8 + $0x1c0] sm:$0xf]  ;;  %v1087_v9 = vld [vmem:[#allocation8 + $0x1c4] sm:$0xf0]  ;;  %v856_v10 = vld [vmem:[#allocation8 + $0xb0] sm:$0xf]  ;;  %v929_v12 = vor.u32 %v1071_v5, %v928_v4  ;;  %v793_v13 = vor.u32 %v1037_v7, %v792_v3 }
  0x26   :  { %643 = vmatpush.bf16.msrb.mxu3 %v1009_v54  ;;  %v1053_v11 = vld [vmem:[#allocation8 + $0xb4] sm:$0xf0]  ;;  %v993_v14 = vor.u32 %v1087_v9, %v992_v8  ;;  %v784_v15 = vld [vmem:[#allocation8 + $0x20] sm:$0xf]  ;;  %v920_v16 = vld [vmem:[#allocation8 + $0x130] sm:$0xf] }
  0x27   :  { %605 = vmatpush.bf16.msrb.mxu0 %v809_v53  ;;  %v1069_v17 = vld [vmem:[#allocation8 + $0x134] sm:$0xf0]  ;;  %v857_v18 = vor.u32 %v1053_v11, %v856_v10  ;;  %v1035_v19 = vld [vmem:[#allocation8 + $0x24] sm:$0xf0]  ;;  %v984_v20 = vld [vmem:[#allocation8 + $0x1b0] sm:$0xf] }
  0x28   :  { %618 = vmatpush.bf16.msrb.mxu1 %v873_v58  ;;  %v1085_v21 = vld [vmem:[#allocation8 + $0x1b4] sm:$0xf0]  ;;  %v848_v22 = vld [vmem:[#allocation8 + $0xa0] sm:$0xf]  ;;  %v1051_v23 = vld [vmem:[#allocation8 + $0xa4] sm:$0xf0]  ;;  %v921_v24 = vor.u32 %v1069_v17, %v920_v16  ;;  %v785_v25 = vor.u32 %v1035_v19, %v784_v15 }
  0x29   :  { %631 = vmatpush.bf16.msrb.mxu2 %v937_v0  ;;  %v985_v26 = vor.u32 %v1085_v21, %v984_v20  ;;  %v776_v27 = vld [vmem:[#allocation8 + $0x10] sm:$0xf]  ;;  %v912_v28 = vld [vmem:[#allocation8 + $0x120] sm:$0xf]  ;;  %v1067_v29 = vld [vmem:[#allocation8 + $0x124] sm:$0xf0]  ;;  %v849_v30 = vor.u32 %v1051_v23, %v848_v22 }
  0x2a   :  { %644 = vmatpush.bf16.msrb.mxu3 %v1001_v2  ;;  %v1033_v31 = vld [vmem:[#allocation8 + $0x14] sm:$0xf0]  ;;  %v976_v32 = vld [vmem:[#allocation8 + $0x1a0] sm:$0xf]  ;;  %v1083_v33 = vld [vmem:[#allocation8 + $0x1a4] sm:$0xf0]  ;;  %v913_v36 = vor.u32 %v1067_v29, %v912_v28 }
  0x2b   :  { %606 = vmatpush.bf16.msrb.mxu0 %v801_v1  ;;  %v840_v34 = vld [vmem:[#allocation8 + $0x90] sm:$0xf]  ;;  %v1049_v35 = vld [vmem:[#allocation8 + $0x94] sm:$0xf0]  ;;  %v777_v37 = vor.u32 %v1033_v31, %v776_v27  ;;  %v977_v38 = vor.u32 %v1083_v33, %v976_v32  ;;  %v768_v40 = vld [vmem:[#allocation8] sm:$0xf] }
  0x2c   :  { %619 = vmatpush.bf16.msrb.mxu1 %v865_v6  ;;  %v841_v39 = vor.u32 %v1049_v35, %v840_v34  ;;  %v1031_v41 = vld [vmem:[#allocation8 + $0x4] sm:$0xf0]  ;;  %v832_v42 = vld [vmem:[#allocation8 + $0x80] sm:$0xf]  ;;  %v1044_v45 = vld [vmem:[#allocation8 + $0x74] sm:$0xf] }
  0x2d   :  { %632 = vmatpush.bf16.msrb.mxu2 %v929_v12  ;;  %v769_v43 = vor.u32 %v1031_v41, %v768_v40  ;;  %v1047_v44 = vld [vmem:[#allocation8 + $0x84] sm:$0xf0]  ;;  %v826_v46 = vld [vmem:[#allocation8 + $0x78] sm:$0xf0]  ;;  %v1060_v49 = vld [vmem:[#allocation8 + $0xf4] sm:$0xf] }
  0x2e   :  { %645 = vmatpush.bf16.msrb.mxu3 %v993_v14  ;;  %v833_v47 = vor.u32 %v1047_v44, %v832_v42  ;;  %v829_v48 = vor.u32 %v1044_v45, %v826_v46  ;;  %v890_v50 = vld [vmem:[#allocation8 + $0xf8] sm:$0xf0]  ;;  %v904_v52 = vld [vmem:[#allocation8 + $0x110] sm:$0xf]  ;;  %v1065_v53 = vld [vmem:[#allocation8 + $0x114] sm:$0xf0] }
  0x2f   :  { %607 = vmatpush.bf16.msrb.mxu0 %v793_v13  ;;  %v893_v51 = vor.u32 %v1060_v49, %v890_v50  ;;  %v968_v54 = vld [vmem:[#allocation8 + $0x190] sm:$0xf]  ;;  %v905_v55 = vor.u32 %v1065_v53, %v904_v52  ;;  %v1081_v56 = vld [vmem:[#allocation8 + $0x194] sm:$0xf0]  ;;  %v1042_v58 = vld [vmem:[#allocation8 + $0x64] sm:$0xf] }
  0x30   :  { %620 = vmatpush.bf16.msrb.mxu1 %v857_v18  ;;  %v969_v57 = vor.u32 %v1081_v56, %v968_v54  ;;  %v818_v59 = vld [vmem:[#allocation8 + $0x68] sm:$0xf0]  ;;  %v1058_v60 = vld [vmem:[#allocation8 + $0xe4] sm:$0xf]  ;;  %v896_v63 = vld [vmem:[#allocation8 + $0x100] sm:$0xf] }
  0x31   :  { %633 = vmatpush.bf16.msrb.mxu2 %v921_v24  ;;  %v821_v61 = vor.u32 %v1042_v58, %v818_v59  ;;  %v882_v62 = vld [vmem:[#allocation8 + $0xe8] sm:$0xf0]  ;;  %v1063_v0 = vld [vmem:[#allocation8 + $0x104] sm:$0xf0]  ;;  %v960_v3 = vld [vmem:[#allocation8 + $0x180] sm:$0xf] }
  0x32   :  { %646 = vmatpush.bf16.msrb.mxu3 %v985_v26  ;;  %v885_v1 = vor.u32 %v1058_v60, %v882_v62  ;;  %v897_v2 = vor.u32 %v1063_v0, %v896_v63  ;;  %v1079_v4 = vld [vmem:[#allocation8 + $0x184] sm:$0xf0]  ;;  %v1076_v5 = vld [vmem:[#allocation8 + $0x174] sm:$0xf]  ;;  %v954_v7 = vld [vmem:[#allocation8 + $0x178] sm:$0xf0] }
  0x33   :  { %608 = vmatpush.bf16.msrb.mxu0 %v785_v25  ;;  %v961_v6 = vor.u32 %v1079_v4, %v960_v3  ;;  %v1092_v8 = vld [vmem:[#allocation8 + $0x1f4] sm:$0xf]  ;;  %v957_v9 = vor.u32 %v1076_v5, %v954_v7  ;;  %v1018_v10 = vld [vmem:[#allocation8 + $0x1f8] sm:$0xf0]  ;;  %v1074_v18 = vld [vmem:[#allocation8 + $0x164] sm:$0xf] }
  0x34   :  { %621 = vmatpush.bf16.msrb.mxu1 %v849_v30  ;;  %v1040_v11 = vld [vmem:[#allocation8 + $0x54] sm:$0xf]  ;;  %v810_v12 = vld [vmem:[#allocation8 + $0x58] sm:$0xf0]  ;;  %v1021_v13 = vor.u32 %v1092_v8, %v1018_v10  ;;  %v946_v19 = vld [vmem:[#allocation8 + $0x168] sm:$0xf0] }
  0x35   :  { %634 = vmatpush.bf16.msrb.mxu2 %v913_v36  ;;  %v813_v14 = vor.u32 %v1040_v11, %v810_v12  ;;  %v1056_v15 = vld [vmem:[#allocation8 + $0xd4] sm:$0xf]  ;;  %v874_v16 = vld [vmem:[#allocation8 + $0xd8] sm:$0xf0]  ;;  %v1090_v20 = vld [vmem:[#allocation8 + $0x1e4] sm:$0xf]  ;;  %v949_v21 = vor.u32 %v1074_v18, %v946_v19 }
  0x36   :  { %647 = vmatpush.bf16.msrb.mxu3 %v977_v38  ;;  %v877_v17 = vor.u32 %v1056_v15, %v874_v16  ;;  %v1010_v22 = vld [vmem:[#allocation8 + $0x1e8] sm:$0xf0]  ;;  %v1038_v24 = vld [vmem:[#allocation8 + $0x44] sm:$0xf]  ;;  %v1072_v30 = vld [vmem:[#allocation8 + $0x154] sm:$0xf] }
  0x37   :  { %609 = vmatpush.bf16.msrb.mxu0 %v777_v37  ;;  %v1013_v23 = vor.u32 %v1090_v20, %v1010_v22  ;;  %v802_v25 = vld [vmem:[#allocation8 + $0x48] sm:$0xf0]  ;;  %v1054_v26 = vld [vmem:[#allocation8 + $0xc4] sm:$0xf]  ;;  %v938_v31 = vld [vmem:[#allocation8 + $0x158] sm:$0xf0] }
  0x38   :  { %622 = vmatpush.bf16.msrb.mxu1 %v841_v39  ;;  %v805_v27 = vor.u32 %v1038_v24, %v802_v25  ;;  %v866_v28 = vld [vmem:[#allocation8 + $0xc8] sm:$0xf0]  ;;  %v1088_v32 = vld [vmem:[#allocation8 + $0x1d4] sm:$0xf]  ;;  %v941_v33 = vor.u32 %v1072_v30, %v938_v31  ;;  %v1002_v34 = vld [vmem:[#allocation8 + $0x1d8] sm:$0xf0] }
  0x39   :  { %635 = vmatpush.bf16.msrb.mxu2 %v905_v55  ;;  %v869_v29 = vor.u32 %v1054_v26, %v866_v28  ;;  %v1005_v35 = vor.u32 %v1088_v32, %v1002_v34  ;;  %v1036_v36 = vld [vmem:[#allocation8 + $0x34] sm:$0xf]  ;;  %v794_v37 = vld [vmem:[#allocation8 + $0x38] sm:$0xf0]  ;;  %v1070_v42 = vld [vmem:[#allocation8 + $0x144] sm:$0xf] }
  0x3a   :  { %648 = vmatpush.bf16.msrb.mxu3 %v969_v57  ;;  %v1052_v38 = vld [vmem:[#allocation8 + $0xb4] sm:$0xf]  ;;  %v797_v39 = vor.u32 %v1036_v36, %v794_v37  ;;  %v858_v40 = vld [vmem:[#allocation8 + $0xb8] sm:$0xf0]  ;;  %v1086_v44 = vld [vmem:[#allocation8 + $0x1c4] sm:$0xf] }
  0x3b   :  { %610 = vmatpush.bf16.msrb.mxu0 %v769_v43  ;;  %v861_v41 = vor.u32 %v1052_v38, %v858_v40  ;;  %v930_v43 = vld [vmem:[#allocation8 + $0x148] sm:$0xf0]  ;;  %v1050_v50 = vld [vmem:[#allocation8 + $0xa4] sm:$0xf]  ;;  %v1068_v54 = vld [vmem:[#allocation8 + $0x134] sm:$0xf] }
  0x3c   :  { %623 = vmatpush.bf16.msrb.mxu1 %v833_v47  ;;  %v933_v45 = vor.u32 %v1070_v42, %v930_v43  ;;  %v994_v46 = vld [vmem:[#allocation8 + $0x1c8] sm:$0xf0]  ;;  %v922_v55 = vld [vmem:[#allocation8 + $0x138] sm:$0xf0]  ;;  %v1084_v56 = vld [vmem:[#allocation8 + $0x1b4] sm:$0xf] }
  0x3d   :  { %636 = vmatpush.bf16.msrb.mxu2 %v897_v2  ;;  %v997_v47 = vor.u32 %v1086_v44, %v994_v46  ;;  %v786_v49 = vld [vmem:[#allocation8 + $0x28] sm:$0xf0]  ;;  %v925_v57 = vor.u32 %v1068_v54, %v922_v55  ;;  %v986_v58 = vld [vmem:[#allocation8 + $0x1b8] sm:$0xf0]  ;;  %v1048_v63 = vld [vmem:[#allocation8 + $0x94] sm:$0xf] }
  0x3e   :  { %649 = vmatpush.bf16.msrb.mxu3 %v961_v6  ;;  %v850_v52 = vld [vmem:[#allocation8 + $0xa8] sm:$0xf0]  ;;  %v1298_v59 = vld [vmem:[#allocation7] sm:$0xf]  ;;  %v989_v60 = vor.u32 %v1084_v56, %v986_v58  ;;  %v1066_v2 = vld [vmem:[#allocation8 + $0x124] sm:$0xf] }
  0x3f   :  { %655 = vmatpush.bf16.msra.mxu0 %v829_v48  ;;  %v1034_v48 = vld [vmem:[#allocation8 + $0x24] sm:$0xf]  ;;  %v853_v53 = vor.u32 %v1050_v50, %v850_v52  ;;  %v778_v62 = vld [vmem:[#allocation8 + $0x18] sm:$0xf0]  ;;  %v914_v3 = vld [vmem:[#allocation8 + $0x128] sm:$0xf0] }
  0x40   :  { %668 = vmatpush.bf16.msra.mxu1 %v893_v51  ;;  %v789_v51 = vor.u32 %v1034_v48, %v786_v49  ;;  %v917_v5 = vor.u32 %v1066_v2, %v914_v3  ;;  %v1082_v6 = vld [vmem:[#allocation8 + $0x1a4] sm:$0xf]  ;;  %v978_v7 = vld [vmem:[#allocation8 + $0x1a8] sm:$0xf0]  ;;  %v1064_v15 = vld [vmem:[#allocation8 + $0x114] sm:$0xf] }
  0x41   :  { %681 = vmatpush.bf16.msra.mxu2 %v957_v9  ;;  %v1030_v8 = vld [vmem:[#allocation8 + $0x4] sm:$0xf]  ;;  %v981_v9 = vor.u32 %v1082_v6, %v978_v7  ;;  %v770_v10 = vld [vmem:[#allocation8 + $0x8] sm:$0xf0]  ;;  %v906_v16 = vld [vmem:[#allocation8 + $0x118] sm:$0xf0] }
  0x42   :  { %694 = vmatpush.bf16.msra.mxu3 %v1021_v13  ;;  %v1046_v11 = vld [vmem:[#allocation8 + $0x84] sm:$0xf]  ;;  %v834_v12 = vld [vmem:[#allocation8 + $0x88] sm:$0xf0]  ;;  %v773_v13 = vor.u32 %v1030_v8, %v770_v10  ;;  %v93_v18 = vperm.slane %v1298_v59, 0  ;;  %v94_v20 = vperm.slane %v1298_v59, 1 }
  0x43   :  { %656 = vmatpush.bf16.msra.mxu0 %v821_v61  ;;  %v1032_v61 = vld [vmem:[#allocation8 + $0x14] sm:$0xf]  ;;  %v970_v19 = vld [vmem:[#allocation8 + $0x198] sm:$0xf0]  ;;  %v1062_v26 = vld [vmem:[#allocation8 + $0x104] sm:$0xf] }
  0x44   :  { %669 = vmatpush.bf16.msra.mxu1 %v885_v1  ;;  %v781_v0 = vor.u32 %v1032_v61, %v778_v62  ;;  %v842_v1 = vld [vmem:[#allocation8 + $0x98] sm:$0xf0]  ;;  %v1078_v28 = vld [vmem:[#allocation8 + $0x184] sm:$0xf]  ;;  %v962_v31 = vld [vmem:[#allocation8 + $0x188] sm:$0xf0] }
  0x45   :  { %682 = vmatpush.bf16.msra.mxu2 %v949_v21  ;;  %v845_v4 = vor.u32 %v1048_v63, %v842_v1  ;;  %v909_v21 = vor.u32 %v1064_v15, %v906_v16  ;;  %v96_v37 = vperm.slane %v1298_v59, 3 }
  0x46   :  { %695 = vmatpush.bf16.msra.mxu3 %v1013_v23 }
  0x47   :  { %657 = vmatpush.bf16.msra.mxu0 %v813_v14  ;;  %v837_v14 = vor.u32 %v1046_v11, %v834_v12 }
  0x48   :  { %670 = vmatpush.bf16.msra.mxu1 %v877_v17  ;;  %v1080_v17 = vld [vmem:[#allocation8 + $0x194] sm:$0xf] }
  0x49   :  { %683 = vmatpush.bf16.msra.mxu2 %v941_v33  ;;  %v973_v22 = vor.u32 %v1080_v17, %v970_v19  ;;  %v965_v33 = vor.u32 %v1078_v28, %v962_v31 }
  0x4a   :  { %696 = vmatpush.bf16.msra.mxu3 %v1005_v35  ;;  %v95_v35 = vperm.slane %v1298_v59, 2  ;;  %v277_v59 = vld [vmem:[%s1314_s4] sm:$0x3]  ;;  %s1251_s4 = smov [#allocation10]  }
  0x4b   :  { %658 = vmatpush.bf16.msra.mxu0 %v805_v27  ;;  %v898_v27 = vld [vmem:[#allocation8 + $0x108] sm:$0xf0]  ;;  %v279_v62 = vperm.slane %v277_v59, 0  ;;  %s716_s15 = sshll.u32 %s1251_s4, 4  ;;  %s717_s15 = int_to_ptr.vmem [resolvable:$true] %s716_s15 }
  0x4c   :  { %671 = vmatpush.bf16.msra.mxu1 %v869_v29  ;;  %v901_v30 = vor.u32 %v1062_v26, %v898_v27 }
  0x4d   :  { %684 = vmatpush.bf16.msra.mxu2 %v933_v45 }
  0x4e   :  { %697 = vmatpush.bf16.msra.mxu3 %v997_v47 }
  0x4f   :  { %659 = vmatpush.bf16.msra.mxu0 %v797_v39 }
  0x50   :  { %672 = vmatpush.bf16.msra.mxu1 %v861_v41 }
  0x51   :  { %685 = vmatpush.bf16.msra.mxu2 %v925_v57 }
  0x52   :  { %698 = vmatpush.bf16.msra.mxu3 %v989_v60 }
  0x53   :  { %660 = vmatpush.bf16.msra.mxu0 %v789_v51 }
  0x54   :  { %673 = vmatpush.bf16.msra.mxu1 %v853_v53 }
  0x55   :  { %686 = vmatpush.bf16.msra.mxu2 %v917_v5 }
  0x56   :  { %699 = vmatpush.bf16.msra.mxu3 %v981_v9  ;;  %v280_v9 = vperm.slane %v277_v59, 1 }
  0x57   :  { %661 = vmatpush.bf16.msra.mxu0 %v781_v0 }
  0x58   :  { %674 = vmatpush.bf16.msra.mxu1 %v845_v4 }
  0x59   :  { %687 = vmatpush.bf16.msra.mxu2 %v909_v21 }
  0x5a   :  { %700 = vmatpush.bf16.msra.mxu3 %v973_v22 }
  0x5b   :  { %662 = vmatpush.bf16.msra.mxu0 %v773_v13 }
  0x5c   :  { %675 = vmatpush.bf16.msra.mxu1 %v837_v14 }
  0x5d   :  { %688 = vmatpush.bf16.msra.mxu2 %v901_v30 }
  0x5e   :  { %701 = vmatpush.bf16.msra.mxu3 %v965_v33 }
  0x9b   :  { %v154_v23 = vpop.f32.mrf.mxu0 }
  0x9c   :  { %v155_v24 = vadd.f32 %v154_v23, %v93_v18  ;;  %v167_v25 = vpop.f32.mrf.mxu1 }
  0x9d   :  { %v168_v29 = vadd.f32 %v167_v25, %v94_v20 }
  0x9e   :  { %v197_v32 = vpack.c.bf16 %v155_v24, %v155_v24 }
  0x9f   :  { %v198_v34 = vpack.c.bf16 %v168_v29, %v168_v29 }
  0xa0   :  { %v201_v36 = vunpack.c.l.bf16 %v197_v32 }
  0xa1   :  { %v202_v38 = vunpack.c.l.bf16 %v198_v34 }
  0xa2   :  { %1103 = vtanh.f32 %v201_v36 }
  0xa3   :  { %v180_v39 = vpop.f32.mrf.mxu2  ;;  %1105 = vtanh.f32 %v202_v38  ;;  %v156_v42 = vpop.f32.mrf.mxu0 }
  0xa4   :  { %v181_v40 = vadd.f32 %v180_v39, %v95_v35  ;;  %v193_v41 = vpop.f32.mrf.mxu3  ;;  %v169_v44 = vpop.f32.mrf.mxu1 }
  0xa5   :  { %v194_v43 = vadd.f32 %v193_v41, %v96_v37 }
  0xa6   :  { %v199_v45 = vpack.c.bf16 %v181_v40, %v181_v40 }
  0xa7   :  { %v200_v46 = vpack.c.bf16 %v194_v43, %v194_v43 }
  0xa8   :  { %v203_v47 = vunpack.c.l.bf16 %v199_v45  ;;  %v1104_v48 = vpop.eup %1103 }
  0xa9   :  { %v204_v49 = vunpack.c.l.bf16 %v200_v46  ;;  %v1106_v50 = vpop.eup %1105  ;;  %v209_v51 = vpack.c.bf16 %v1104_v48, %v1104_v48 }
  0xaa   :  { %1107 = vtanh.f32 %v203_v47  ;;  %v210_v52 = vpack.c.bf16 %v1106_v50, %v1106_v50 }
  0xab   :  { %1109 = vtanh.f32 %v204_v49  ;;  %v182_v53 = vpop.f32.mrf.mxu2  ;;  %611 = vmatmul.bf16.vlgmr.msrb.gmra.mxu0 %v209_v51 }
  0xac   :  { %v195_v54 = vpop.f32.mrf.mxu3  ;;  %624 = vmatmul.bf16.vlgmr.msrb.gmra.mxu1 %v210_v52 }
  0xb0   :  { %v1108_v55 = vpop.eup %1107 }
  0xb1   :  { %v1110_v56 = vpop.eup %1109  ;;  %v211_v57 = vpack.c.bf16 %v1108_v55, %v1108_v55 }
  0xb2   :  { %v212_v58 = vpack.c.bf16 %v1110_v56, %v1110_v56 }
  0xb3   :  { %637 = vmatmul.bf16.vlgmr.msrb.gmra.mxu2 %v211_v57 }
  0xb4   :  { %650 = vmatmul.bf16.vlgmr.msrb.gmra.mxu3 %v212_v58 }
  0xbb   :  { %663 = vmatmul.bf16.vlgmr.msra.gmra.mxu0 %v209_v51 }
  0xbc   :  { %676 = vmatmul.bf16.vlgmr.msra.gmra.mxu1 %v210_v52 }
  0xc3   :  { %689 = vmatmul.bf16.vlgmr.msra.gmra.mxu2 %v211_v57 }
  0xc4   :  { %702 = vmatmul.bf16.vlgmr.msra.gmra.mxu3 %v212_v58 }
 0x128   :  { %v612_v60 = vpop.f32.mrf.mxu0 }
 0x129   :  { %v625_v61 = vpop.f32.mrf.mxu1  ;;  %v613_v63 = vadd.f32 %v612_v60, %v279_v62 }
 0x12b   :  { %v626_v2 = vadd.f32 %v625_v61, %v613_v63 }
 0x130   :  { %v614_v0 = vpop.f32.mrf.mxu0 }
 0x131   :  { %v627_v1 = vpop.f32.mrf.mxu1 }
 0x136   :  { %v638_v3 = vpop.f32.mrf.mxu2 }
 0x137   :  { %v639_v4 = vadd.f32 %v638_v3, %v626_v2  ;;  %v651_v5 = vpop.f32.mrf.mxu3 }
 0x138   :  { %v664_v7 = vpop.f32.mrf.mxu0 }
 0x139   :  { %v652_v6 = vadd.f32 %v651_v5, %v639_v4  ;;  %v677_v8 = vpop.f32.mrf.mxu1  ;;  %v665_v13 = vadd.f32 %v664_v7, %v280_v9 }
 0x13b   :  { %1111 = vtanh.f32 %v652_v6  ;;  %v678_v16 = vadd.f32 %v677_v8, %v665_v13 }
 0x13e   :  { %v640_v10 = vpop.f32.mrf.mxu2 }
 0x13f   :  { %v653_v11 = vpop.f32.mrf.mxu3 }
 0x140   :  { %v666_v14 = vpop.f32.mrf.mxu0 }
 0x141   :  { %v1112_v12 = vpop.eup %1111  ;;  %v679_v15 = vpop.f32.mrf.mxu1 }
 0x142   :  { %709 = vst [vmem:[#allocation10] sm:$0xff] %v1112_v12 }
 0x146   :  { %v690_v17 = vpop.f32.mrf.mxu2 }
 0x147   :  { %v691_v18 = vadd.f32 %v690_v17, %v678_v16  ;;  %v703_v19 = vpop.f32.mrf.mxu3 }
 0x149   :  { %v704_v20 = vadd.f32 %v703_v19, %v691_v18 }
 0x14b   :  { %1113 = vtanh.f32 %v704_v20 }
 0x14e   :  { %v692_v21 = vpop.f32.mrf.mxu2 }
 0x14f   :  { %v705_v22 = vpop.f32.mrf.mxu3 }
 0x151   :  { %v1114_v23 = vpop.eup %1113 }
 0x152   :  { %710 = vst [vmem:[#allocation10 + $0x8] sm:$0xff] %v1114_v23 }
 0x153   :  { %721 = dma.vmem_to_hbm [thread:$0]  %s717_s15, 256, %s719_s18, [#allocation4]  }
 0x154   :  { %1241 = dma.done.wait [#allocation4], 256  }
 0x155   :  { %1242 = vsyncadd [#allocation4], 4294967040 }
 0x156   :  { %726 = vsyncpa [#allocation3], 1 }
 0x157   :  { %727 = vsyncpa [#allocation6], 1 }
 0x158   :  { %728 = vsyncpa [#allocation9], 1 }
 0x159   :  { %729 = vsyncpa [#allocation4], 1 }

</bundles_post_ra>
